<compile_context>
chip_gen: v6e
topology: v6e:2x2x1
jax: 0.10.0
libtpu: 0.0.40
codegen_flags: <defaults>
</compile_context>

<pallas_src>
import jax
import jax.numpy as jnp
from jax.experimental import pallas as pl
from jax.experimental.pallas import tpu as pltpu


def _round_up(x, m):
    return ((x + m - 1) // m) * m


def mymodel_forward(z, x_latent, x_unet, spec_real, spec_imag, params, *, ft_tile=None):
    B, C, Fl, Tl = x_latent.shape
    Bx, Cx, F, T = x_unet.shape
    D = z.shape[1]
    H = params["w1"].shape[1]          # MLP hidden (== query_size == C)
    N = params["w3"].shape[1]          # n_masks
    TlC = Tl * C
    FT = F * T
    BFl = B * Fl

    assert Bx == B
    assert Cx == Fl, "einsum 'bcft,bcn->bnft' needs unet channels == latent F dim"
    assert params["w2"].shape == (H, H)
    assert N <= H, "n_masks must fit inside the padded weight pack (N <= hidden)"

    # ---- FT tile (lane) size: parallel grid axis over the spectrogram --------
    if ft_tile is None:
        # largest multiple of 128 (<= 2048 lanes) dividing FT; else the full FT.
        ft_tile = FT
        cand = (min(FT, 2048) // 128) * 128
        while cand >= 128:
            if FT % cand == 0:
                ft_tile = cand
                break
            cand -= 128
    assert FT % ft_tile == 0
    num_tiles = FT // ft_tile

    # ---- host-side glue: layout-only reshapes & parameter packing -----------
    # latent [B, C, Fl, Tl] -> [B*Fl, Tl*C]  (t-major lanes: lane = t*C + c)
    lat2 = jnp.transpose(x_latent, (0, 2, 3, 1)).reshape(BFl, TlC)
    # query rows [z | 1]; the ones column folds the FiLM + layer-1 biases into
    # the fused projection matmul (no broadcast bias adds in the kernel).
    z_rows = jnp.repeat(z, Fl, axis=0)                               # [B*Fl, D]
    z_aug = jnp.concatenate([z_rows, jnp.ones((BFl, 1), z.dtype)], axis=1)
    # unet decoder output as a 2-D row matrix (row = b*Fl + c), lanes = F*T
    x2 = x_unet.reshape(BFl, FT)
    # mixture spectrogram (real, imag) stacked: [2, B, F*T]
    spec_pack = jnp.stack([spec_real.reshape(B, FT),
                           spec_imag.reshape(B, FT)], axis=0)

    # W1 rows permuted to the t-major lane layout: new row t*C + c <- old c*Tl + t
    W1 = params["w1"]
    w1p = W1.reshape(C, Tl, H).transpose(1, 0, 2).reshape(TlC, H)
    W1sum = W1.reshape(C, Tl, H).sum(axis=1)                         # [C, H]

    # Fused FiLM projection weight [D+1, Tl*C + H]:
    #   cols [0:TlC)      -> gamma, pre-tiled so the matmul emits gamma_e directly
    #   cols [TlC:TlC+H)  -> beta folded through layer 1: beta @ W1sum (+ b1)
    wfilm = jnp.concatenate([
        jnp.concatenate([jnp.tile(params["wg"], (1, Tl)),
                         params["wb"] @ W1sum], axis=1),
        jnp.concatenate([jnp.tile(params["bg"], (1, Tl)),
                         params["bb"] @ W1sum + params["b1"]], axis=1),
    ], axis=0)

    # Remaining narrow weights/biases packed into ONE operand (8-row aligned
    # sections so in-kernel static slices stay on sublane-group boundaries).
    w3pad = jnp.pad(params["w3"], ((0, 0), (0, H - N)))
    b3pad = jnp.pad(params["b3"], ((0, 0), (0, H - N)))

    def pad_rows(a, rows):
        return jnp.pad(a, ((0, rows - a.shape[0]), (0, 0)))

    r_w1p, r_wh = _round_up(TlC, 8), _round_up(H, 8)
    wpack = jnp.concatenate([
        pad_rows(w1p, r_w1p),
        pad_rows(params["w2"], r_wh),
        pad_rows(w3pad, r_wh),
        pad_rows(params["b2"], 8),
        pad_rows(b3pad, 8),
    ], axis=0)                                                       # [Rpack, H]
    off_w1 = 0
    off_w2 = off_w1 + r_w1p
    off_w3 = off_w2 + r_wh
    off_b2 = off_w3 + r_wh
    off_b3 = off_b2 + 8

    # ---- kernel --------------------------------------------------------------
    def kernel(z_ref, lat_ref, x_ref, spec_ref, wfilm_ref, wpack_ref, out_ref):
        # Fused FiLM projection: [gamma_e | beta@W1sum + b1] = [z | 1] @ Wfilm
        gb = jnp.dot(z_ref[...], wfilm_ref[...],
                     preferred_element_type=jnp.float32)             # [BFl, TlC+H]
        gamma_e = gb[:, :TlC]            # already expanded to t-major lanes
        h1_beta = gb[:, TlC:]            # additive FiLM, folded through layer 1
        y = gamma_e * lat_ref[...]       # FiLM (multiplicative part)

        # MLP (num_layers=3: ReLU on first two, linear last) — whole batch at once
        h1 = jnp.maximum(
            jnp.dot(y, wpack_ref[off_w1:off_w1 + TlC, :],
                    preferred_element_type=jnp.float32) + h1_beta, 0.0)
        h2 = jnp.maximum(
            jnp.dot(h1, wpack_ref[off_w2:off_w2 + H, :],
                    preferred_element_type=jnp.float32)
            + wpack_ref[off_b2:off_b2 + 1, :], 0.0)
        m = jnp.dot(h2, wpack_ref[off_w3:off_w3 + H, :],
                    preferred_element_type=jnp.float32) \
            + wpack_ref[off_b3:off_b3 + 1, :]                        # [BFl, H], cols >= N are padding

        # einsum 'bcft,bcn->bnft' on the VPU (N tiny): broadcast-mul + Fl reduce
        x_t = x_ref[...]                 # [B*Fl, ft_tile]
        sr = spec_ref[0]                 # [B, ft_tile]  (real)
        si = spec_ref[1]                 # [B, ft_tile]  (imag)
        pred, m_re, m_im = [], [], []
        for n in range(N):               # static, tiny (n_masks = 1)
            prod = x_t * m[:, n:n + 1]                               # lane-broadcast mul
            p = jnp.sum(prod.reshape(B, Fl, ft_tile), axis=1)        # [B, ft_tile]
            pred.append(p)
            m_re.append(sr * p)
            m_im.append(si * p)
        # ONE lane/sublane-dense store: row = group*(N*B) + n*B + b
        out_ref[...] = jnp.concatenate(pred + m_re + m_im, axis=0)

    # ---- specs / call --------------------------------------------------------
    const2 = lambda i: (0, 0)
    inputs = (z_aug, lat2, x2, spec_pack, wfilm, wpack)
    in_specs = [
        pl.BlockSpec(z_aug.shape, const2),                            # resident
        pl.BlockSpec(lat2.shape, const2),                             # resident
        pl.BlockSpec((BFl, ft_tile), lambda i: (0, i)),               # FT-tiled
        pl.BlockSpec((2, B, ft_tile), lambda i: (0, 0, i)),           # FT-tiled
        pl.BlockSpec(wfilm.shape, const2),                            # resident
        pl.BlockSpec(wpack.shape, const2),                            # resident
    ]
    out_specs = pl.BlockSpec((3 * N * B, ft_tile), lambda i: (0, i))

    matmul_flops = 2 * BFl * ((D + 1) * (TlC + H) + TlC * H + 2 * H * H) * num_tiles
    vpu_flops = 2 * N * BFl * FT + 2 * 2 * N * B * FT + BFl * TlC * num_tiles
    in_bytes = sum(int(a.size) * a.dtype.itemsize for a in inputs)
    out_bytes = 3 * N * B * FT * 4
    cost = pl.CostEstimate(flops=int(matmul_flops + vpu_flops),
                           transcendentals=0,
                           bytes_accessed=int(in_bytes + out_bytes))

    out = pl.pallas_call(
        kernel,
        out_shape=jax.ShapeDtypeStruct((3 * N * B, FT), jnp.float32),
        grid=(num_tiles,),
        in_specs=in_specs,
        out_specs=out_specs,
        compiler_params=pltpu.CompilerParams(dimension_semantics=("parallel",)),
        cost_estimate=cost,
    )(*inputs)

    # host-side layout glue only: rows are (group, n, b)-major
    out = out.reshape(3, N, B, F, T).transpose(0, 2, 1, 3, 4)        # [3, B, N, F, T]
    return out[0], out[1], out[2]


def reference_forward(z, x_latent, x_unet, spec_real, spec_imag, params):
    """Pure-JAX reference mirroring the PyTorch FiLM branch."""
    gamma = z @ params["wg"] + params["bg"]                          # [B, C]
    beta = z @ params["wb"] + params["bb"]                           # [B, C]
    y = gamma[:, :, None, None] * x_latent + beta[:, :, None, None]  # FiLM
    y = jnp.transpose(y, (0, 2, 1, 3))                               # permute(0,2,1,3)
    B, Fl, C, Tl = y.shape
    y = y.reshape(B, Fl, C * Tl)                                     # MLP's reshape
    h1 = jax.nn.relu(y @ params["w1"] + params["b1"])
    h2 = jax.nn.relu(h1 @ params["w2"] + params["b2"])
    m = h2 @ params["w3"] + params["b3"]                             # [B, Fl, N]
    pred = jnp.einsum('bcft,bcn->bnft', x_unet, m)
    return pred, spec_real * pred, spec_imag * pred


if __name__ == "__main__":
    # Small shapes consistent with the module structure:
    #   embedding D, query_size C (= MLP hidden), latent spatial (Fl, Tl),
    #   unet-output channels Cx == Fl (einsum 'c'), spectrogram (F, T), n_masks N.
    B, D, C, Fl, Tl = 2, 32, 64, 8, 4
    Cx, F, T, N = Fl, 16, 16, 1

    key = jax.random.PRNGKey(0)
    keys = jax.random.split(key, 16)
    f32 = jnp.float32

    z = jax.random.normal(keys[0], (B, D), f32)                      # query embedding (Passt out)
    x_latent = jax.random.normal(keys[1], (B, C, Fl, Tl), f32)       # UNet latent
    x_unet = jax.random.normal(keys[2], (B, Cx, F, T), f32)          # UNet decoder output
    spec_real = jax.random.normal(keys[3], (B, 1, F, T), f32)        # mixture STFT (real)
    spec_imag = jax.random.normal(keys[4], (B, 1, F, T), f32)        # mixture STFT (imag)

    sc = 0.1
    params = dict(
        wg=sc * jax.random.normal(keys[5], (D, C), f32),
        bg=sc * jax.random.normal(keys[6], (1, C), f32),
        wb=sc * jax.random.normal(keys[7], (D, C), f32),
        bb=sc * jax.random.normal(keys[8], (1, C), f32),
        w1=sc * jax.random.normal(keys[9], (C * Tl, C), f32),
        b1=sc * jax.random.normal(keys[10], (1, C), f32),
        w2=sc * jax.random.normal(keys[11], (C, C), f32),
        b2=sc * jax.random.normal(keys[12], (1, C), f32),
        w3=sc * jax.random.normal(keys[13], (C, N), f32),
        b3=sc * jax.random.normal(keys[14], (1, N), f32),
    )

    # ft_tile=128 -> a 2-step "parallel" FT grid (exercises the megacore axis /
    # pipelined path); pass ft_tile=None to auto-pick the largest dividing tile.
    pred, tr, ti = mymodel_forward(z, x_latent, x_unet, spec_real, spec_imag,
                                   params, ft_tile=128)
    jax.block_until_ready((pred, tr, ti))

    ref_pred, ref_tr, ref_ti = reference_forward(z, x_latent, x_unet,
                                                 spec_real, spec_imag, params)
    assert jnp.allclose(pred, ref_pred, rtol=1e-3, atol=1e-3), "pred_mask mismatch"
    assert jnp.allclose(tr, ref_tr, rtol=1e-3, atol=1e-3), "masked real mismatch"
    assert jnp.allclose(ti, ref_ti, rtol=1e-3, atol=1e-3), "masked imag mismatch"
    print("KERNEL_OK")
</pallas_src>

<mosaic_0001>
module attributes {stable_mosaic.version = 11 : i64} {
  func.func @kernel(%arg0: i32, %arg1: memref<16x33xf32, #tpu.memory_space<vmem>>, %arg2: memref<16x256xf32, #tpu.memory_space<vmem>>, %arg3: memref<16x128xf32, #tpu.memory_space<vmem>>, %arg4: memref<2x2x128xf32, #tpu.memory_space<vmem>>, %arg5: memref<33x320xf32, #tpu.memory_space<vmem>>, %arg6: memref<400x64xf32, #tpu.memory_space<vmem>>, %arg7: memref<6x128xf32, #tpu.memory_space<vmem>>) attributes {dimension_semantics = [#tpu.dimension_semantics<parallel>], iteration_bounds = array<i64: 2>, scalar_prefetch = 0 : i64, scratch_operands = 0 : i64, tpu.core_type = #tpu.core_type<tc>, window_params = [{pipeline_mode = #tpu.pipeline_mode<synchronous>, transform_indices = @transform_0, window_bounds = array<i64: 16, 33>}, {pipeline_mode = #tpu.pipeline_mode<synchronous>, transform_indices = @transform_1, window_bounds = array<i64: 16, 256>}, {transform_indices = @transform_2, window_bounds = array<i64: 16, 128>}, {transform_indices = @transform_3, window_bounds = array<i64: 2, 2, 128>}, {pipeline_mode = #tpu.pipeline_mode<synchronous>, transform_indices = @transform_4, window_bounds = array<i64: 33, 320>}, {pipeline_mode = #tpu.pipeline_mode<synchronous>, transform_indices = @transform_5, window_bounds = array<i64: 400, 64>}, {transform_indices = @transform_6, window_bounds = array<i64: 6, 128>}]} {
    %c0 = arith.constant 0 : index
    %c0_0 = arith.constant 0 : index
    %0 = vector.load %arg1[%c0, %c0_0] : memref<16x33xf32, #tpu.memory_space<vmem>>, vector<16x33xf32>
    %c0_1 = arith.constant 0 : index
    %c0_2 = arith.constant 0 : index
    %1 = vector.load %arg5[%c0_1, %c0_2] : memref<33x320xf32, #tpu.memory_space<vmem>>, vector<33x320xf32>
    %cst = arith.constant dense<0.000000e+00> : vector<16x320xf32>
    %2 = tpu.matmul %0, %1, %cst {dimension_numbers = #tpu.dot_dimension_numbers<[1], [0], [0], [1], [0, 0, 1, 1], [], []>} : vector<16x33xf32>, vector<33x320xf32>, vector<16x320xf32> -> vector<16x320xf32>
    %3 = vector.extract_strided_slice %2 {offsets = [0, 0], sizes = [16, 256], strides = [1, 1]} : vector<16x320xf32> to vector<16x256xf32>
    %4 = vector.extract_strided_slice %2 {offsets = [0, 256], sizes = [16, 64], strides = [1, 1]} : vector<16x320xf32> to vector<16x64xf32>
    %c0_3 = arith.constant 0 : index
    %c0_4 = arith.constant 0 : index
    %5 = vector.load %arg2[%c0_3, %c0_4] : memref<16x256xf32, #tpu.memory_space<vmem>>, vector<16x256xf32>
    %6 = arith.mulf %3, %5 : vector<16x256xf32>
    %c0_5 = arith.constant 0 : index
    %c0_6 = arith.constant 0 : index
    %7 = vector.load %arg6[%c0_5, %c0_6] : memref<400x64xf32, #tpu.memory_space<vmem>>, vector<256x64xf32>
    %cst_7 = arith.constant dense<0.000000e+00> : vector<16x64xf32>
    %8 = tpu.matmul %6, %7, %cst_7 {dimension_numbers = #tpu.dot_dimension_numbers<[1], [0], [0], [1], [0, 0, 1, 1], [], []>} : vector<16x256xf32>, vector<256x64xf32>, vector<16x64xf32> -> vector<16x64xf32>
    %9 = arith.addf %8, %4 : vector<16x64xf32>
    %cst_8 = arith.constant 0.000000e+00 : f32
    %10 = vector.broadcast %cst_8 : f32 to vector<16x64xf32>
    %11 = arith.maximumf %9, %10 : vector<16x64xf32>
    %c256 = arith.constant 256 : index
    %c0_9 = arith.constant 0 : index
    %12 = vector.load %arg6[%c256, %c0_9] : memref<400x64xf32, #tpu.memory_space<vmem>>, vector<64x64xf32>
    %cst_10 = arith.constant dense<0.000000e+00> : vector<16x64xf32>
    %13 = tpu.matmul %11, %12, %cst_10 {dimension_numbers = #tpu.dot_dimension_numbers<[1], [0], [0], [1], [0, 0, 1, 1], [], []>} : vector<16x64xf32>, vector<64x64xf32>, vector<16x64xf32> -> vector<16x64xf32>
    %c384 = arith.constant 384 : index
    %c0_11 = arith.constant 0 : index
    %14 = vector.load %arg6[%c384, %c0_11] : memref<400x64xf32, #tpu.memory_space<vmem>>, vector<1x64xf32>
    %15 = vector.broadcast %14 : vector<1x64xf32> to vector<16x64xf32>
    %16 = arith.addf %13, %15 : vector<16x64xf32>
    %cst_12 = arith.constant 0.000000e+00 : f32
    %17 = vector.broadcast %cst_12 : f32 to vector<16x64xf32>
    %18 = arith.maximumf %16, %17 : vector<16x64xf32>
    %c320 = arith.constant 320 : index
    %c0_13 = arith.constant 0 : index
    %19 = vector.load %arg6[%c320, %c0_13] : memref<400x64xf32, #tpu.memory_space<vmem>>, vector<64x64xf32>
    %cst_14 = arith.constant dense<0.000000e+00> : vector<16x64xf32>
    %20 = tpu.matmul %18, %19, %cst_14 {dimension_numbers = #tpu.dot_dimension_numbers<[1], [0], [0], [1], [0, 0, 1, 1], [], []>} : vector<16x64xf32>, vector<64x64xf32>, vector<16x64xf32> -> vector<16x64xf32>
    %c392 = arith.constant 392 : index
    %c0_15 = arith.constant 0 : index
    %21 = vector.load %arg6[%c392, %c0_15] : memref<400x64xf32, #tpu.memory_space<vmem>>, vector<1x64xf32>
    %22 = vector.broadcast %21 : vector<1x64xf32> to vector<16x64xf32>
    %23 = arith.addf %20, %22 : vector<16x64xf32>
    %c0_16 = arith.constant 0 : index
    %c0_17 = arith.constant 0 : index
    %24 = vector.load %arg3[%c0_16, %c0_17] : memref<16x128xf32, #tpu.memory_space<vmem>>, vector<16x128xf32>
    %c0_18 = arith.constant 0 : index
    %c0_19 = arith.constant 0 : index
    %c0_20 = arith.constant 0 : index
    %25 = vector.load %arg4[%c0_18, %c0_19, %c0_20] : memref<2x2x128xf32, #tpu.memory_space<vmem>>, vector<1x2x128xf32>
    %26 = vector.shape_cast %25 : vector<1x2x128xf32> to vector<2x128xf32>
    %c1 = arith.constant 1 : index
    %c0_21 = arith.constant 0 : index
    %c0_22 = arith.constant 0 : index
    %27 = vector.load %arg4[%c1, %c0_21, %c0_22] : memref<2x2x128xf32, #tpu.memory_space<vmem>>, vector<1x2x128xf32>
    %28 = vector.shape_cast %27 : vector<1x2x128xf32> to vector<2x128xf32>
    %29 = vector.extract_strided_slice %23 {offsets = [0, 0], sizes = [16, 1], strides = [1, 1]} : vector<16x64xf32> to vector<16x1xf32>
    %30 = vector.broadcast %29 : vector<16x1xf32> to vector<16x128xf32>
    %31 = arith.mulf %24, %30 : vector<16x128xf32>
    %32 = vector.shape_cast %31 : vector<16x128xf32> to vector<2x8x128xf32>
    %cst_23 = arith.constant dense<0.000000e+00> : vector<2x128xf32>
    %33 = vector.multi_reduction <add>, %32, %cst_23 [1] : vector<2x8x128xf32> to vector<2x128xf32>
    %34 = arith.mulf %26, %33 : vector<2x128xf32>
    %35 = arith.mulf %28, %33 : vector<2x128xf32>
    %36 = tpu.concatenate %33, %34, %35 in 0 : vector<2x128xf32>, vector<2x128xf32>, vector<2x128xf32> -> vector<6x128xf32>
    %c0_24 = arith.constant 0 : index
    %c0_25 = arith.constant 0 : index
    %37 = vector.load %arg7[%c0_24, %c0_25] : memref<6x128xf32, #tpu.memory_space<vmem>>, vector<6x128xf32>
    tpu.vector_store %arg7[%c0_24, %c0_25], %36 {strides = array<i32>} : memref<6x128xf32, #tpu.memory_space<vmem>>, vector<6x128xf32>,
    return
  }
  func.func @transform_0(%arg0: i32) -> (i32, i32) {
    %c0_i32 = arith.constant 0 : i32
    %c0_i32_0 = arith.constant 0 : i32
    %c0_i32_1 = arith.constant 0 : i32
    return %c0_i32, %c0_i32_0 : i32, i32
  }
  func.func @transform_1(%arg0: i32) -> (i32, i32) {
    %c0_i32 = arith.constant 0 : i32
    %c0_i32_0 = arith.constant 0 : i32
    %c0_i32_1 = arith.constant 0 : i32
    return %c0_i32, %c0_i32_0 : i32, i32
  }
  func.func @transform_2(%arg0: i32) -> (i32, i32) {
    %c0_i32 = arith.constant 0 : i32
    %c0_i32_0 = arith.constant 0 : i32
    return %c0_i32, %arg0 : i32, i32
  }
  func.func @transform_3(%arg0: i32) -> (i32, i32, i32) {
    %c0_i32 = arith.constant 0 : i32
    %c0_i32_0 = arith.constant 0 : i32
    %c0_i32_1 = arith.constant 0 : i32
    return %c0_i32, %c0_i32_0, %arg0 : i32, i32, i32
  }
  func.func @transform_4(%arg0: i32) -> (i32, i32) {
    %c0_i32 = arith.constant 0 : i32
    %c0_i32_0 = arith.constant 0 : i32
    %c0_i32_1 = arith.constant 0 : i32
    return %c0_i32, %c0_i32_0 : i32, i32
  }
  func.func @transform_5(%arg0: i32) -> (i32, i32) {
    %c0_i32 = arith.constant 0 : i32
    %c0_i32_0 = arith.constant 0 : i32
    %c0_i32_1 = arith.constant 0 : i32
    return %c0_i32, %c0_i32_0 : i32, i32
  }
  func.func @transform_6(%arg0: i32) -> (i32, i32) {
    %c0_i32 = arith.constant 0 : i32
    %c0_i32_0 = arith.constant 0 : i32
    return %c0_i32, %arg0 : i32, i32
  }
}

</mosaic_0001>

<bundles_post_ra>
// kernel: tpu_custom_call.1
= control target key start
LH: loop header
LB: loop body
LE: loop exit
PB: predicated region body
PF: predicated region fallthrough
CT: control target
= control target key end

     0   :  { %11 = vsyncpa [#allocation5], 0  ;;  %s1619_s0 = inlined_call_operand.vmem [shape: f32[16,33], index: 0, kind: input, shape index: {}]   ;;  %s1620_s1 = inlined_call_operand.vmem [shape: f32[16,256], index: 1, kind: input, shape index: {}]   ;;  %s1621_s2 = inlined_call_operand.vmem [shape: f32[16,256], index: 2, kind: input, shape index: {}]   ;;  %s1622_s3 = inlined_call_operand.vmem [shape: f32[2,2,256], index: 3, kind: input, shape index: {}]   ;;  %s1623_s4 = inlined_call_operand.vmem [shape: f32[33,320], index: 4, kind: input, shape index: {}]   ;;  %s1624_s5 = inlined_call_operand.vmem [shape: f32[400,64], index: 5, kind: input, shape index: {}]   ;;  %s1625_s6 = inlined_call_operand.hbm [shape: f32[6,256], index: 6, kind: output, shape index: {}]  }
   0x1   :  { %13 = vsyncpa [#allocation5 + $0x1], 0  ;;  %s1273_s21 = smov 0   ;;  %s1275_s22 = smov 0  }
   0x2   :  { %s1277_s23 = smov 0   ;;  %s1279_s24 = smov 0  }
   0x3 LB: > { %s985_s25 = sadd.s32 4294967295, %s1233_s24   ;;  %s986_s26 = sadd.s32 4294967294, %s1233_s24   ;;  %s1233_s24 = sphi %s1279_s24, %s1632_s24   ;;  %s1229_s23 = sphi %s1277_s23, %s1631_s23   ;;  %s1225_s22 = sphi %s1275_s22, %s1630_s22   ;;  %s1221_s21 = sphi %s1273_s21, %s1629_s21  }
   0x4   : > { %s1296_s27 = sadd.s32 1, %s1233_s24   ;;  %s68_s28 = sadd.s32 1, %s1229_s23 }
   0x5   : > { %s65_s29 = ssub.s32 %s1233_s24, %s1296_s27  ;;  %p75_p0 = scmp.ne.s32.totalorder %s1229_s23, %s1225_s22 }
   0x6   : > { %p66_p1 = scmp.eq.s32.totalorder %s65_s29, 0  ;;  %p76_p2 = scmp.eq.s32.totalorder %s1233_s24, 0 }
   0x7   : > { %p173_p3 = scmp.eq.s32.totalorder %s985_s25, 1  ;;  %p178_p4 = scmp.ne.s32.totalorder %s1225_s22, %s1221_s21 }
   0x8   : > { %s1309_s30 = scalar_select %p66_p1, %s1229_s23, %s68_s28  }
   0x9   : > { %p1311_p5 = por %p76_p2, %p75_p0  ;;  %p1315_p6 = por %p173_p3, %p75_p0 }
   0xa   : > { %p179_p7 = scmp.eq.s32.totalorder %s986_s26, 1  ;;  %p988_p9 = scmp.ge.s32.totalorder %s1233_s24, 2 }
   0xc   : > { %p1319_p8 = por %p179_p7, %p178_p4  ;;  %207 = sbr.rel (%p988_p9) target bundleno = 27 (0x1b), region = 32 }
  0x11   : > { %210 = sbr.rel (!%p1311_p5) target bundleno = 22 (0x16), region = 36  ;;  %s212_s10 = sand.u32 (%p1311_p5), 1, %s1229_s23  }
  0x12   : > { %s990_s11 = sshll.u32 (%p1311_p5), %s1233_s24, 3  ;;  %s989_s12 = sshll.u32 (%p1311_p5), %s212_s10, 4 }
  0x13   : > { %s216_s15 = scalar_lea.vmem (%p1311_p5), %s1621_s2, %s990_s11  ;;  %s214_s16 = scalar_lea.vmem (%p1311_p5), [#allocation2], %s989_s12 }
  0x14   : > { %v247_v0 = vld [vmem:[%s216_s15] sm:$0xff] (%p1311_p5)  ;;  %v249_v1 = vld [vmem:[%s216_s15 + $0x10] sm:$0xff] (%p1311_p5) }
  0x15   : > { %248 = vst [vmem:[%s214_s16] sm:$0xff] (%p1311_p5), %v247_v0  ;;  %250 = vst [vmem:[%s214_s16 + $0x8] sm:$0xff] (%p1311_p5), %v249_v1 }
  0x16 PF: > { %256 = sbr.rel (!%p1311_p5) target bundleno = 27 (0x1b), region = 74  ;;  %s258_s17 = sand.u32 (%p1311_p5), 1, %s1229_s23  }
  0x17   : > { %s992_s18 = sshll.u32 (%p1311_p5), %s1233_s24, 1  ;;  %s991_s19 = sshll.u32 (%p1311_p5), %s258_s17, 2 }
  0x18   : > { %s262_s28 = scalar_lea.vmem (%p1311_p5), %s1622_s3, %s992_s18  ;;  %s260_s29 = scalar_lea.vmem (%p1311_p5), [#allocation3], %s991_s19 }
  0x19   : > { %v279_v2 = vld [vmem:[%s262_s28] sm:$0x3] (%p1311_p5)  ;;  %v281_v3 = vld [vmem:[%s262_s28 + $0x4] sm:$0x3] (%p1311_p5) }
  0x1a   : > { %280 = vst [vmem:[%s260_s29] sm:$0x3] (%p1311_p5), %v279_v2  ;;  %282 = vst [vmem:[%s260_s29 + $0x2] sm:$0x3] (%p1311_p5), %v281_v3 }
  0x1b PF: > { %p993_p10 = scmp.ge.s32.totalorder %s1233_s24, 1  ;;  %p301_p11 = scmp.lt.s32.totalorder %s1233_s24, 3 }
  0x1d   : > { %p302_p12 = pnand %p993_p10, %p301_p11 }
  0x1e   : > { %s1572_s16 = sand.u32 (!%p302_p12), 1, %s1225_s22   ;;  %s1012_s28 = sshll.u32 (!%p302_p12), %s985_s25, 7 }
  0x1f   : > { %305 = sbr.rel (%p302_p12) target bundleno = 1009 (0x3f1), region = 108  ;;  %s994_s17 = sshll.u32 (!%p302_p12), %s1572_s16, 4 }
  0x20   : > { %s310_s18 = scalar_lea.vmem (!%p302_p12), [#allocation2], %s994_s17  ;;  %s995_s19 = sshll.u32 (!%p302_p12), %s1572_s16, 2 }
  0x21   : > { %s996_s20 = sshll.u32 (!%p302_p12), %s1572_s16, 3  ;;  %s317_s26 = scalar_lea.vmem (!%p302_p12), [#allocation3], %s995_s19 }
  0x22   : > { %s347_s29 = scalar_lea.vmem (!%p302_p12), [#allocation4], %s996_s20  ;;  %s1582_s12 = scalar_lea.hbm (!%p302_p12), %s1625_s6, %s1012_s28 }
  0x23   : > { %s903_s7 = sshll.u32 (!%p302_p12), %s347_s29, 4  ;;  %s890_s13 = scalar_lea.sflag (!%p302_p12), [#allocation5], %s1572_s16  ;;  %s904_s7 = int_to_ptr.vmem [resolvable:$true] %s903_s7 }
  0x24   : > { %v363_v4 = vld [vmem:[%s1623_s4 + $0x68] sm:$0x1]  ;;  %vm372_vm0 = vcmask 1040384   ;;  %v362_v5 = vld [vmem:[%s1623_s4 + $0x60] sm:$0x1]  ;;  %v360_v6 = vld [vmem:[%s1623_s4 + $0x50] sm:$0xff] }
  0x25   : > { %997 = vmatprep.subr.msk.mxu0 %vm372_vm0, %v363_v4  ;;  %v359_v7 = vld [vmem:[%s1623_s4 + $0x48] sm:$0xff]  ;;  %v357_v8 = vld [vmem:[%s1623_s4 + $0x38] sm:$0xff]  ;;  %v1235_v9 = vmov 0.0   ;;  %v356_v10 = vld [vmem:[%s1623_s4 + $0x30] sm:$0xff]  ;;  %vm365_vm1 = vcmask 269312   ;;  %vm664_vm2 = vcmask 523264  }
  0x26   : > { %998 = vmatpush1.msk.msra.mxu0 %vm372_vm0, %v362_v5  ;;  %446 = vmatprep.mubr.f32.mxu0 %v1235_v9  ;;  %v348_v11 = vld [vmem:[%s1619_s0] sm:$0xff]  ;;  %v353_v13 = vld [vmem:[%s1623_s4 + $0x18] sm:$0xff]  ;;  %v351_v14 = vld [vmem:[%s1623_s4 + $0x8] sm:$0xff]  ;;  %vm873_vm3 = vcmask 1041409   ;;  %vm884_vm4 = vcmask 1041408   ;;  %vm886_vm5 = vcmask 1043456  }
  0x27   : > { %406 = vmatprep.subr.mxu0 %v360_v6  ;;  %v354_v12 = vld [vmem:[%s1623_s4 + $0x20] sm:$0xff]  ;;  %1090 = vmatprep.mubr.msk.f32.mxu1 %vm365_vm1, %v348_v11  ;;  %v573_v16 = vld [vmem:[%s1624_s5 + $0xf8] sm:$0xff]  ;;  %v572_v18 = vld [vmem:[%s1624_s5 + $0xf0] sm:$0xff]  ;;  %s1173_s14 = scalar_lea.vmem %s904_s7, 128  ;;  %s1237_s25 = smov [#allocation4]  }
  0x28   : > { %407 = vmatpush1.msra.mxu0 %v359_v7  ;;  %v350_v15 = vld [vmem:[%s1623_s4] sm:$0xff]  ;;  %v557_v17 = vld [vmem:[%s1624_s5 + $0x78] sm:$0xff]  ;;  %v556_v19 = vld [vmem:[%s1624_s5 + $0x70] sm:$0xff]  ;;  %p1174_p13 = scmp.ne.s32.totalorder %s904_s7, %s1173_s14  ;;  %s1177_s15 = sshll.u32 %s1237_s25, 4  ;;  %s1178_s15 = int_to_ptr.vmem [resolvable:$false] %s1177_s15 }
  0x29   : > { %408 = vmatprep.subr.mxu0 %v357_v8  ;;  %v1394_v20 = vld [vmem:[%s1619_s0 + $0x8] sm:$0xff]  ;;  %v364_v22 = vld [vmem:[%s1623_s4 + $0x70] sm:$0x1]  ;;  %v570_v24 = vld [vmem:[%s1624_s5 + $0xe0] sm:$0xff]  ;;  %s1179_s17 = scalar_lea.vmem %s1178_s15, 256  ;;  %p1180_p2 = scmp.lt.s32.totalorder %s904_s7, %s1178_s15 }
  0x2a   : > { %409 = vmatpush1.msra.mxu0 %v356_v10  ;;  %v571_v21 = vld [vmem:[%s1624_s5 + $0xe8] sm:$0xff]  ;;  %1080 = vmatprep.subr.msk.mxu1 %vm372_vm0, %v364_v22  ;;  %v554_v25 = vld [vmem:[%s1624_s5 + $0x60] sm:$0xff]  ;;  %v569_v26 = vld [vmem:[%s1624_s5 + $0xd8] sm:$0xff]  ;;  %p1175_p0 = pnand %p1174_p13, %p1315_p6  ;;  %p1181_p3 = scmp.lt.s32.totalorder %s1179_s17, %s1173_s14 }
  0x2b   : > { %410 = vmatprep.subr.mxu0 %v354_v12  ;;  %v555_v23 = vld [vmem:[%s1624_s5 + $0x68] sm:$0xff]  ;;  %1081 = vmatpush3.msk.msra.mxu1 %vm372_vm0, %v364_v22  ;;  %v553_v27 = vld [vmem:[%s1624_s5 + $0x58] sm:$0xff]  ;;  %v568_v28 = vld [vmem:[%s1624_s5 + $0xd0] sm:$0xff] }
  0x2c   : > { %411 = vmatpush1.msra.mxu0 %v353_v13  ;;  %v552_v29 = vld [vmem:[%s1624_s5 + $0x50] sm:$0xff]  ;;  %v567_v30 = vld [vmem:[%s1624_s5 + $0xc8] sm:$0xff]  ;;  %v566_v32 = vld [vmem:[%s1624_s5 + $0xc0] sm:$0xff]  ;;  %p1176_p1 = pneg %p1175_p0  ;;  %p1182_p4 = por %p1181_p3, %p1180_p2 }
  0x2d   : > { %412 = vmatprep.subr.mxu0 %v351_v14  ;;  %v551_v31 = vld [vmem:[%s1624_s5 + $0x48] sm:$0xff]  ;;  %v550_v33 = vld [vmem:[%s1624_s5 + $0x40] sm:$0xff]  ;;  %v565_v34 = vld [vmem:[%s1624_s5 + $0xb8] sm:$0xff] }
  0x2e   : > { %413 = vmatpush1.msra.mxu0 %v350_v15  ;;  %v549_v35 = vld [vmem:[%s1624_s5 + $0x38] sm:$0xff]  ;;  %v564_v36 = vld [vmem:[%s1624_s5 + $0xb0] sm:$0xff]  ;;  %v563_v38 = vld [vmem:[%s1624_s5 + $0xa8] sm:$0xff]  ;;  %p1183_p5 = pnand %p1182_p4, %p1176_p1 }
  0x2f   : > { %999 = vmatmul.mubr.msk.f32.vlgmr.msra.gmra.mxu0 %vm365_vm1, %v348_v11  ;;  %1022 = vmatprep.subr.mxu0 %v573_v16  ;;  %v548_v37 = vld [vmem:[%s1624_s5 + $0x30] sm:$0xff]  ;;  %v547_v39 = vld [vmem:[%s1624_s5 + $0x28] sm:$0xff]  ;;  %v562_v40 = vld [vmem:[%s1624_s5 + $0xa0] sm:$0xff] }
  0x30   : > { %452 = vmatprep.mubr.f32.mxu0 %v1235_v9  ;;  %1023 = vmatpush3.msra.mxu0 %v557_v17  ;;  %v546_v41 = vld [vmem:[%s1624_s5 + $0x20] sm:$0xff]  ;;  %v561_v42 = vld [vmem:[%s1624_s5 + $0x98] sm:$0xff]  ;;  %v560_v45 = vld [vmem:[%s1624_s5 + $0x90] sm:$0xff] }
  0x31   : > { %1024 = vmatprep.subr.mxu0 %v572_v18  ;;  %v545_v43 = vld [vmem:[%s1624_s5 + $0x18] sm:$0xff]  ;;  %v544_v46 = vld [vmem:[%s1624_s5 + $0x10] sm:$0xff]  ;;  %v358_v47 = vld [vmem:[%s1623_s4 + $0x40] sm:$0xff] }
  0x32   : > { %1025 = vmatpush3.msra.mxu0 %v556_v19  ;;  %v361_v44 = vld [vmem:[%s1623_s4 + $0x58] sm:$0xff]  ;;  %v559_v48 = vld [vmem:[%s1624_s5 + $0x88] sm:$0xff]  ;;  %v558_v51 = vld [vmem:[%s1624_s5 + $0x80] sm:$0xff] }
  0x33   : > { %1000 = vmatmul.mubr.msk.f32.gmra.mxu0 %vm365_vm1, %v1394_v20  ;;  %1026 = vmatprep.subr.mxu0 %v571_v21  ;;  %v543_v49 = vld [vmem:[%s1624_s5 + $0x8] sm:$0xff]  ;;  %v542_v52 = vld [vmem:[%s1624_s5] sm:$0xff]  ;;  %v352_v53 = vld [vmem:[%s1623_s4 + $0x10] sm:$0xff] }
  0x34   : > { %1027 = vmatpush3.msra.mxu0 %v555_v23  ;;  %1082 = vmatprep.subr.mxu1 %v361_v44  ;;  %v355_v50 = vld [vmem:[%s1623_s4 + $0x28] sm:$0xff]  ;;  %v658_v54 = vld [vmem:[%s1624_s5 + $0x138] sm:$0xff]  ;;  %v657_v55 = vld [vmem:[%s1624_s5 + $0x130] sm:$0xff] }
  0x35   : > { %1028 = vmatprep.subr.mxu0 %v570_v24  ;;  %1083 = vmatpush3.msra.mxu1 %v361_v44  ;;  %v535_v57 = vld [vmem:[%s1620_s1 + $0x8] sm:$0xff]  ;;  %v534_v58 = vld [vmem:[%s1620_s1] sm:$0xff]  ;;  %v537_v63 = vld [vmem:[%s1620_s1 + $0x18] sm:$0xff] }
  0x36   : > { %1029 = vmatpush3.msra.mxu0 %v554_v25  ;;  %1084 = vmatprep.subr.mxu1 %v358_v47  ;;  %v536_v0 = vld [vmem:[%s1620_s1 + $0x10] sm:$0xff]  ;;  %v656_v4 = vld [vmem:[%s1624_s5 + $0x128] sm:$0xff]  ;;  %v655_v5 = vld [vmem:[%s1624_s5 + $0x120] sm:$0xff] }
  0x37   : > { %1030 = vmatprep.subr.mxu0 %v569_v26  ;;  %1085 = vmatpush3.msra.mxu1 %v358_v47  ;;  %v654_v6 = vld [vmem:[%s1624_s5 + $0x118] sm:$0xff]  ;;  %v653_v7 = vld [vmem:[%s1624_s5 + $0x110] sm:$0xff]  ;;  %v652_v8 = vld [vmem:[%s1624_s5 + $0x108] sm:$0xff] }
  0x38   : > { %1031 = vmatpush3.msra.mxu0 %v553_v27  ;;  %1086 = vmatprep.subr.mxu1 %v355_v50  ;;  %v651_v9 = vld [vmem:[%s1624_s5 + $0x100] sm:$0xff]  ;;  %v755_v10 = vld [vmem:[%s1624_s5 + $0x178] sm:$0xff]  ;;  %v754_v23 = vld [vmem:[%s1624_s5 + $0x170] sm:$0xff] }
  0x39   : > { %1032 = vmatprep.subr.mxu0 %v568_v28  ;;  %1087 = vmatpush3.msra.mxu1 %v355_v50  ;;  %v753_v24 = vld [vmem:[%s1624_s5 + $0x168] sm:$0xff]  ;;  %v752_v25 = vld [vmem:[%s1624_s5 + $0x160] sm:$0xff]  ;;  %v751_v26 = vld [vmem:[%s1624_s5 + $0x158] sm:$0xff] }
  0x3a   : > { %1033 = vmatpush3.msra.mxu0 %v552_v29  ;;  %1088 = vmatprep.subr.mxu1 %v352_v53  ;;  %v750_v27 = vld [vmem:[%s1624_s5 + $0x150] sm:$0xff]  ;;  %v749_v28 = vld [vmem:[%s1624_s5 + $0x148] sm:$0xff]  ;;  %v748_v29 = vld [vmem:[%s1624_s5 + $0x140] sm:$0xff] }
  0x3b   : > { %1034 = vmatprep.subr.mxu0 %v567_v30  ;;  %1089 = vmatpush3.msra.mxu1 %v352_v53  ;;  %v1004_v30 = vld [vmem:[%s1624_s5 + $0x180] ss:$0 sm:$0xff] }
  0x3c   : > { %1035 = vmatpush3.msra.mxu0 %v551_v31  ;;  %1091 = vmatmul.mubr.msk.f32.vlgmr.msra.gmra.mxu1 %vm365_vm1, %v1394_v20 }
  0x3d   : > { %1036 = vmatprep.subr.mxu0 %v566_v32  ;;  %1093 = vmatprep.subr.mxu1 %v658_v54 }
  0x3e   : > { %1037 = vmatpush3.msra.mxu0 %v550_v33  ;;  %1094 = vmatpush3.msra.mxu1 %v658_v54 }
  0x3f   : > { %1038 = vmatprep.subr.mxu0 %v565_v34  ;;  %1095 = vmatprep.subr.mxu1 %v657_v55 }
  0x40   : > { %1039 = vmatpush3.msra.mxu0 %v549_v35  ;;  %1096 = vmatpush3.msra.mxu1 %v657_v55 }
  0x41   : > { %1040 = vmatprep.subr.mxu0 %v564_v36  ;;  %1097 = vmatprep.subr.mxu1 %v656_v4 }
  0x42   : > { %1041 = vmatpush3.msra.mxu0 %v548_v37  ;;  %1098 = vmatpush3.msra.mxu1 %v656_v4  ;;  %v1236_v37 = vmov 0  }
  0x43   : > { %1042 = vmatprep.subr.mxu0 %v563_v38  ;;  %1099 = vmatprep.subr.mxu1 %v655_v5 }
  0x44   : > { %1043 = vmatpush3.msra.mxu0 %v547_v39  ;;  %1100 = vmatpush3.msra.mxu1 %v655_v5  ;;  %v1007_v39 = vld [vmem:[%s1624_s5 + $0x188] ss:$0 sm:$0xff] }
  0x45   : > { %1044 = vmatprep.subr.mxu0 %v562_v40  ;;  %1101 = vmatprep.subr.mxu1 %v654_v6 }
  0x46   : > { %1045 = vmatpush3.msra.mxu0 %v546_v41  ;;  %1102 = vmatpush3.msra.mxu1 %v654_v6 }
  0x47   : > { %1046 = vmatprep.subr.mxu0 %v561_v42  ;;  %1103 = vmatprep.subr.mxu1 %v653_v7 }
  0x48   : > { %1047 = vmatpush3.msra.mxu0 %v545_v43  ;;  %1104 = vmatpush3.msra.mxu1 %v653_v7  ;;  %v842_v43 = vld [vmem:[%s310_s18] sm:$0xff] }
  0x49   : > { %1048 = vmatprep.subr.mxu0 %v560_v45  ;;  %1105 = vmatprep.subr.mxu1 %v652_v8 }
  0x4a   : > { %1049 = vmatpush3.msra.mxu0 %v544_v46  ;;  %1106 = vmatpush3.msra.mxu1 %v652_v8  ;;  %v843_v46 = vld [vmem:[%s310_s18 + $0x8] sm:$0xff] }
  0x4b   : > { %1050 = vmatprep.subr.mxu0 %v559_v48  ;;  %1107 = vmatprep.subr.mxu1 %v651_v9 }
  0x4c   : > { %1051 = vmatpush3.msra.mxu0 %v543_v49  ;;  %1108 = vmatpush3.msra.mxu1 %v651_v9 }
  0x4d   : > { %1052 = vmatprep.subr.mxu0 %v558_v51  ;;  %1112 = vmatprep.subr.mxu1 %v755_v10 }
  0x4e   : > { %1053 = vmatpush3.msra.mxu0 %v542_v52  ;;  %1172 = vset.pattern.permute.xlu0 %v1236_v37 }
  0xef   : > { %v448_v56 = vpop.f32.mrf.mxu0 }
  0xf0   : > { %v538_v61 = vmul.f32 %v534_v58, %v448_v56 }
  0xf1   : > { %v450_v59 = vpop.f32.mrf.mxu0 }
  0xf2   : > { %v539_v60 = vmul.f32 %v535_v57, %v450_v59  ;;  %v844_v59 = vld [vmem:[%s317_s26] sm:$0x3] }
  0xf3   : > { %v454_v62 = vpop.f32.mrf.mxu0 }
  0xf4   : > { %638 = vmatprep.mubr.f32.mxu0 %v539_v60  ;;  %v540_v3 = vmul.f32 %v536_v0, %v454_v62  ;;  %v1010_v62 = vld [vmem:[%s317_s26 + $0x2] sm:$0x3] }
  0xf5   : > { %v456_v1 = vpop.f32.mrf.mxu0  ;;  %639 = vmatmul.mubr.f32.vlgmr.msra.gmra.mxu0 %v538_v61 }
  0xf6   : > { %v541_v2 = vmul.f32 %v537_v63, %v456_v1 }
  0xf8   : > { %643 = vmatprep.mubr.f32.mxu0 %v541_v2 }
  0xf9   : > { %644 = vmatmul.mubr.f32.gmra.mxu0 %v540_v3 }
  0xfc   : > { %v1092_v11 = vpop.f32.mrf.mxu1 }
  0xfe   : > { %v525_v14 = vpop.f32.mrf.mxu1 }
 0x1b5   : > { %v1054_v12 = vpop.f32.mrf.mxu0 }
 0x1b7   : > { %v1055_v13 = vpop.f32.mrf.mxu0 }
 0x1b8   : > { %v1056_v15 = vadd.f32 %v1055_v13, %v1054_v12 }
 0x1b9   : > { %v1057_v16 = vpop.f32.mrf.mxu0 }
 0x1ba   : > { %v641_v17 = vadd.f32 %v1056_v15, %v525_v14 }
 0x1bb   : > { %v1058_v18 = vpop.f32.mrf.mxu0 }
 0x1bc   : > { %v649_v19 = vmax.f32 %v641_v17, 0.0  ;;  %v1059_v20 = vadd.f32 %v1058_v18, %v1057_v16 }
 0x1be   : > { %v646_v21 = vadd.f32 %v1092_v11, %v1059_v20  ;;  %1109 = vmatprep.mubr.msk.f32.mxu1 %vm664_vm2, %v649_v19 }
 0x1c0   : > { %v650_v22 = vmax.f32 %v646_v21, 0.0 }
 0x1c2   : > { %1110 = vmatmul.mubr.msk.f32.vlgmr.msra.gmra.mxu1 %vm664_vm2, %v650_v22 }
 0x1c3   : > { %1113 = vmatpush3.msra.mxu1 %v755_v10 }
 0x1c4   : > { %1114 = vmatprep.subr.mxu1 %v754_v23 }
 0x1c5   : > { %1115 = vmatpush3.msra.mxu1 %v754_v23 }
 0x1c6   : > { %1116 = vmatprep.subr.mxu1 %v753_v24 }
 0x1c7   : > { %1117 = vmatpush3.msra.mxu1 %v753_v24 }
 0x1c8   : > { %1118 = vmatprep.subr.mxu1 %v752_v25 }
 0x1c9   : > { %1119 = vmatpush3.msra.mxu1 %v752_v25 }
 0x1ca   : > { %1120 = vmatprep.subr.mxu1 %v751_v26 }
 0x1cb   : > { %1121 = vmatpush3.msra.mxu1 %v751_v26 }
 0x1cc   : > { %1122 = vmatprep.subr.mxu1 %v750_v27 }
 0x1cd   : > { %1123 = vmatpush3.msra.mxu1 %v750_v27 }
 0x1ce   : > { %1124 = vmatprep.subr.mxu1 %v749_v28 }
 0x1cf   : > { %1125 = vmatpush3.msra.mxu1 %v749_v28 }
 0x1d0   : > { %1126 = vmatprep.subr.mxu1 %v748_v29 }
 0x1d1   : > { %1127 = vmatpush3.msra.mxu1 %v748_v29 }
 0x282   : > { %v1111_v31 = vpop.f32.mrf.mxu1 }
 0x283   : > { %v743_v32 = vadd.f32 %v1111_v31, %v1004_v30 }
 0x284   : > { %v737_v33 = vpop.f32.mrf.mxu1 }
 0x285   : > { %v738_v34 = vadd.f32 %v1004_v30, %v737_v33  ;;  %v747_v36 = vmax.f32 %v743_v32, 0.0 }
 0x287   : > { %v746_v35 = vmax.f32 %v738_v34, 0.0 }
 0x289   : > { %1128 = vmatprep.mubr.msk.f32.mxu1 %vm664_vm2, %v746_v35 }
 0x28a   : > { %1129 = vmatmul.mubr.msk.f32.vlgmr.msra.gmra.mxu1 %vm664_vm2, %v747_v36 }
 0x34a   : > { %v1130_v38 = vpop.f32.mrf.mxu1 }
 0x34b   : > { %v839_v42 = vadd.f32 %v1130_v38, %v1007_v39 }
 0x34c   : > { %v833_v40 = vpop.f32.mrf.mxu1 }
 0x34d   : > { %v834_v41 = vadd.f32 %v1007_v39, %v833_v40 }
 0x34f   : > { %849 = vperm.xlu0 %1172, %v834_v41  }
 0x353   : > { %854 = vperm.xlu0 %1172, %v839_v42  }
 0x3ca   : > { %v850_v44 = vpop.permute.xlu0 %849 }
 0x3cb   : > { %v857_v45 = vmul.f32 %v850_v44, %v842_v43 }
 0x3cd   : > { %v859_v47 = vrot.slane %v857_v45, 4 }
 0x3ce   : > { %v855_v48 = vpop.permute.xlu0 %854 }
 0x3cf   : > { %v860_v49 = vadd.f32 %v859_v47, %v857_v45  ;;  %v858_v50 = vmul.f32 %v855_v48, %v843_v46 }
 0x3d1   : > { %v861_v51 = vrot.slane %v860_v49, 2  ;;  %v865_v52 = vrot.slane %v858_v50, 4 }
 0x3d3   : > { %v862_v53 = vadd.f32 %v861_v51, %v860_v49  ;;  %v866_v54 = vadd.f32 %v865_v52, %v858_v50 }
 0x3d5   : > { %v867_v55 = vrot.slane %v866_v54, 2  ;;  %v863_v56 = vrot.slane %v862_v53, 1 }
 0x3d7   : > { %v868_v57 = vadd.f32 %v867_v55, %v866_v54  ;;  %v864_v60 = vadd.f32 %v863_v56, %v862_v53 }
 0x3d9   : > { %v869_v58 = vrot.slane %v868_v57, 1 }
 0x3db   : > { %v870_v61 = vadd.f32 %v869_v58, %v868_v57 }
 0x3dd   : > { %v874_v63 = vsel %vm873_vm3, %v870_v61, %v864_v60 }
 0x3de   : > { %v876_v0 = vmul.f32 %v874_v63, %v844_v59  ;;  %v877_v1 = vmul.f32 %v1010_v62, %v874_v63 }
 0x3e0   : > { %v879_v2 = vrot.slane %v876_v0, 6  ;;  %v882_v3 = vrot.slane %v877_v1, 4 }
 0x3e2   : > { %v885_v4 = vsel %vm884_vm4, %v874_v63, %v879_v2 }
 0x3e3   : > { %v887_v5 = vsel %vm886_vm5, %v885_v4, %v882_v3 }
 0x3e4   : > { %888 = vst [vmem:[%s347_s29] sm:$0x3f] %v887_v5 }
 0x3e5   : > { %1186 = shalt.err (!%p1183_p5)
}
 0x3e6   : > { %s1187_s18 = scalar_lea.hbm %s1582_s12, 128  ;;  %s1191_s20 = scalar_lea.hbm %s1625_s6, 256 }
 0x3e7   : > { %p1188_p7 = scmp.ne.s32.totalorder %s1582_s12, %s1187_s18  ;;  %p1192_p12 = scmp.lt.s32.totalorder %s1582_s12, %s1625_s6 }
 0x3e8   : > { %p1193_p13 = scmp.lt.s32.totalorder %s1191_s20, %s1187_s18 }
 0x3e9   : > { %p1189_p10 = pnand %p1188_p7, %p1315_p6 }
 0x3ea   : > { %p1194_p0 = por %p1193_p13, %p1192_p12 }
 0x3eb   : > { %p1190_p11 = pneg %p1189_p10 }
 0x3ed   : > { %p1195_p1 = pnand %p1194_p0, %p1190_p11 }
 0x3ef   : > { %1198 = shalt.err (!%p1195_p1)
}
 0x3f0   : > { %1131 = dma.vmem_to_hbm [thread:$0]  (%p1315_p6), %s904_s7, 128, %s1582_s12, %s890_s13  }
 0x3f1 PF: > { %s915_s29 = sand.u32 1, %s1221_s21   ;;  %p1134_p2 = pnand %p988_p9, %p1319_p8 }
 0x3f2   : > { %s916_s10 = scalar_lea.sflag [#allocation5], %s915_s29 }
 0x3f3   : > { %p1135_p3 = pneg %p1134_p2 }
 0x3f5   : > { %1216 = dma.done.wait (%p1135_p3), %s916_s10, 128  }
 0x3f6   : > { %1218 = vsyncadd (%p1135_p3), %s916_s10, 4294967168  ;;  %p16_p4 = scmp.ge.s32.totalorder %s1296_s27, 4   ;;  %s1629_s21 = smov %s1225_s22 }
 0x3f7   : > { %s1630_s22 = smov %s1229_s23  ;;  %s1631_s23 = smov %s1309_s30 }
 0x3f8   : > { %s1632_s24 = smov %s1296_s27  ;;  %18 = sbr.rel (!%p16_p4) target bundleno = 3 (0x3), region = 165 }
 0x3fd   :  { %921 = vsyncpa [#allocation5], 1 }
 0x3fe   :  { %923 = vsyncpa [#allocation5 + $0x1], 1 }

</bundles_post_ra>
